<compile_context>
chip_gen: v5e
topology: v5e:2x2
jax: 0.10.0
libtpu: 0.0.40
codegen_flags: <defaults>
</compile_context>

<pallas_src>
import functools
import math

import jax
import jax.numpy as jnp
from jax.experimental import pallas as pl
from jax.experimental.pallas import tpu as pltpu


def _fused_gated_gcn_kernel(
    xs0_ref, xd0_ref,
    ef0_ref, g0_ref, s0_ref, invdeg0_ref,
    r2_ref,
    ef1_ref, g1_ref, s1_ref, invdeg1_ref,
    w1a_ref, w2a_ref, ua_ref, va_ref,
    w1b_ref, w2b_ref, ub_ref, vb_ref,
    out_ref,
    *, leaky_slope):
    """Two fused GatedGCN layers.  Feature layout is [N, B*C] (batch folded
    onto the lane axis), so one [E, N] / [N, E] one-hot matmul covers every
    batch and BatchNorm stats are plain row reductions."""

    def layer(xs_bf, xd_bf, ef_ref, g_ref, s_ref, invdeg_ref,
              w1_ref, w2_ref, u_ref, v_ref):
        # node / edge linear projections (MXU: bf16 in, f32 accumulate)
        xs_t = jnp.dot(xs_bf, w1_ref[...], preferred_element_type=jnp.float32)
        xd_t = jnp.dot(xd_bf, w1_ref[...], preferred_element_type=jnp.float32)
        e_emb = jnp.dot(ef_ref[...], w2_ref[...],
                        preferred_element_type=jnp.float32)
        # gather source-node features onto edges (shared 0/1 one-hot, exact in bf16)
        x_j = jnp.dot(g_ref[...], xs_t.astype(jnp.bfloat16),
                      preferred_element_type=jnp.float32)
        # message: edge_emb * (x_j @ V)
        msg = e_emb * jnp.dot(x_j.astype(jnp.bfloat16), v_ref[...],
                              preferred_element_type=jnp.float32)
        # scatter-mean onto destination nodes: 0/1 scatter matmul then the
        # precomputed 1/clamp(deg,1) (no in-kernel reduce or divide)
        aggr = jnp.dot(s_ref[...], msg.astype(jnp.bfloat16),
                       preferred_element_type=jnp.float32) * invdeg_ref[...]
        # update: pre = x_dst @ U + aggr
        pre = jnp.dot(xd_t.astype(jnp.bfloat16), u_ref[...],
                      preferred_element_type=jnp.float32) + aggr
        # BatchNorm1d(num_features=N_dst), training-mode batch stats:
        # per node over (batch, out_channels) == per-row over the lane axis.
        inv_n = 1.0 / pre.shape[1]
        mean = jnp.sum(pre, axis=1, keepdims=True) * inv_n
        var = jnp.sum((pre - mean) ** 2, axis=1, keepdims=True) * inv_n
        normed = (pre - mean) * jax.lax.rsqrt(var + 1e-5)
        # residual + relu
        return xd_t + jnp.maximum(normed, 0.0)

    # ---- layer 1 (conv1) ----
    x1 = layer(xs0_ref[...], xd0_ref[...], ef0_ref, g0_ref, s0_ref,
               invdeg0_ref, w1a_ref, w2a_ref, ua_ref, va_ref)
    # inter-layer leaky_relu (elementwise, f32) then res_n_id[1] row selection
    x1 = jnp.where(x1 >= 0, x1, leaky_slope * x1)
    xs1_bf = x1.astype(jnp.bfloat16)
    xd1_bf = jnp.dot(r2_ref[...], xs1_bf,
                     preferred_element_type=jnp.float32).astype(jnp.bfloat16)
    # ---- layer 2 (conv2) ----
    out_ref[...] = layer(xs1_bf, xd1_bf, ef1_ref, g1_ref, s1_ref, invdeg1_ref,
                         w1b_ref, w2b_ref, ub_ref, vb_ref)


def _flatten_batch_to_lanes(x):
    """[B, N, C] -> [N, B*C]  (lane index = b*C + c)."""
    B, N, C = x.shape
    return jnp.transpose(x, (1, 0, 2)).reshape(N, B * C)


def _block_diag(w, batch):
    """[Ci, Co] -> kron(I_B, W) : [B*Ci, B*Co] (batch-major blocks)."""
    return jnp.kron(jnp.eye(batch, dtype=w.dtype), w)


def gated_gcn_net(X, g, params, *, leaky_slope=0.01):
    """GatedGCNNet.forward with skip_connection=False (the module default)."""
    # TODO(synk): skip_connection=True branch (concat of leaky_relu(X) and X) not implemented.
    edge_index = g['edge_index']
    edge_weight = g['edge_weight']
    res_n_id = g['res_n_id']
    p1, p2 = params['conv1'], params['conv2']

    B, N0, _ = X.shape
    N1 = int(res_n_id[0].shape[0])      # dst nodes of layer 1 (= src of layer 2)
    N2 = int(res_n_id[1].shape[0])      # dst nodes of layer 2
    S = p1['W1'].shape[1]               # spatial_channels
    O = p2['W1'].shape[1]               # out_channels
    bf16 = jnp.bfloat16

    def edge_mats(ei, n_src, n_dst):
        src = ei[0].astype(jnp.int32)
        dst = ei[1].astype(jnp.int32)
        gather = (src[:, None] == jnp.arange(n_src, dtype=jnp.int32)[None, :])
        scatter = (jnp.arange(n_dst, dtype=jnp.int32)[:, None] == dst[None, :])
        deg = jnp.sum(scatter.astype(jnp.float32), axis=1, keepdims=True)
        inv_deg = 1.0 / jnp.maximum(deg, 1.0)
        return gather.astype(bf16), scatter.astype(bf16), inv_deg

    G0, S0, invdeg0 = edge_mats(edge_index[0], N0, N1)
    G1, S1, invdeg1 = edge_mats(edge_index[1], N1, N2)
    R2 = (res_n_id[1].astype(jnp.int32)[:, None]
          == jnp.arange(N1, dtype=jnp.int32)[None, :]).astype(bf16)

    xs0 = _flatten_batch_to_lanes(X.astype(jnp.float32)).astype(bf16)
    xd0 = _flatten_batch_to_lanes(
        X[:, res_n_id[0]].astype(jnp.float32)).astype(bf16)
    ef0 = edge_weight[0].astype(bf16)
    ef1 = edge_weight[1].astype(bf16)

    # batch-block-diagonal weights (kron) / batch-tiled edge weights
    W1a = _block_diag(p1['W1'].astype(jnp.float32), B).astype(bf16)
    Ua = _block_diag(p1['U'].astype(jnp.float32), B).astype(bf16)
    Va = _block_diag(p1['V'].astype(jnp.float32), B).astype(bf16)
    W2a = jnp.tile(p1['W2'].astype(jnp.float32), (1, B)).astype(bf16)
    W1b = _block_diag(p2['W1'].astype(jnp.float32), B).astype(bf16)
    Ub = _block_diag(p2['U'].astype(jnp.float32), B).astype(bf16)
    Vb = _block_diag(p2['V'].astype(jnp.float32), B).astype(bf16)
    W2b = jnp.tile(p2['W2'].astype(jnp.float32), (1, B)).astype(bf16)

    vmem = pl.BlockSpec(memory_space=pltpu.MemorySpace.VMEM)
    out_flat = pl.pallas_call(
        functools.partial(_fused_gated_gcn_kernel, leaky_slope=leaky_slope),
        out_shape=jax.ShapeDtypeStruct((N2, B * O), jnp.float32),
        in_specs=[vmem] * 19,
        out_specs=vmem,
        compiler_params=pltpu.CompilerParams(
            vmem_limit_bytes=32 * 1024 * 1024),
    )(xs0, xd0, ef0, G0, S0, invdeg0, R2, ef1, G1, S1, invdeg1,
      W1a, W2a, Ua, Va, W1b, W2b, Ub, Vb)

    # [N2, B*O] (lane = b*O + o)  ->  [B, N2, O]
    return jnp.transpose(out_flat.reshape(N2, B, O), (1, 0, 2))


# ---------------- pure-JAX f32 reference (for a sanity check) ----------------
def _ref_layer(x_src, x_dst, edge_index, edge_feat, W1, W2, U, V):
    _, Nd, _ = x_dst.shape
    xs_t = x_src @ W1
    xd_t = x_dst @ W1
    e = edge_feat @ W2
    x_j = xs_t[:, edge_index[0]]
    msg = e[None] * (x_j @ V)
    onehot = (jnp.arange(Nd)[:, None] == edge_index[1][None, :]).astype(jnp.float32)
    deg = jnp.maximum(onehot.sum(axis=1, keepdims=True), 1.0)
    aggr = jnp.einsum('ne,beo->bno', onehot, msg) / deg[None]
    pre = xd_t @ U + aggr
    mean = pre.mean(axis=(0, 2), keepdims=True)
    var = ((pre - mean) ** 2).mean(axis=(0, 2), keepdims=True)
    normed = (pre - mean) * jax.lax.rsqrt(var + 1e-5)
    return xd_t + jnp.maximum(normed, 0.0)


def _ref_net(X, g, params):
    p1, p2 = params['conv1'], params['conv2']
    X1 = _ref_layer(X, X[:, g['res_n_id'][0]], g['edge_index'][0],
                    g['edge_weight'][0], p1['W1'], p1['W2'], p1['U'], p1['V'])
    X1 = jnp.where(X1 >= 0, X1, 0.01 * X1)
    return _ref_layer(X1, X1[:, g['res_n_id'][1]], g['edge_index'][1],
                      g['edge_weight'][1], p2['W1'], p2['W2'], p2['U'], p2['V'])


def xavier_uniform(key, fan_in, fan_out):
    bound = math.sqrt(6.0 / (fan_in + fan_out))
    return jax.random.uniform(key, (fan_in, fan_out), jnp.float32, -bound, bound)


if __name__ == "__main__":
    key = jax.random.PRNGKey(0)
    keys = jax.random.split(key, 16)

    # small, module-consistent shapes
    B = 2
    in_channels = 4
    spatial_channels = 16   # module default
    out_channels = 8
    edge_channels = 1       # module default
    N0, N1, N2 = 16, 8, 4   # src nodes L1, dst L1 (= src L2), dst L2
    E0, E1 = 24, 12

    X = jax.random.normal(keys[0], (B, N0, in_channels), jnp.float32)
    ei0 = jnp.stack([jax.random.randint(keys[1], (E0,), 0, N0),
                     jax.random.randint(keys[2], (E0,), 0, N1)]).astype(jnp.int32)
    ei1 = jnp.stack([jax.random.randint(keys[3], (E1,), 0, N1),
                     jax.random.randint(keys[4], (E1,), 0, N2)]).astype(jnp.int32)
    ew0 = jax.random.normal(keys[5], (E0, edge_channels), jnp.float32)
    ew1 = jax.random.normal(keys[6], (E1, edge_channels), jnp.float32)

    g = dict(
        edge_index=[ei0, ei1],
        edge_weight=[ew0, ew1],
        size=[(N0, N1), (N1, N2)],
        res_n_id=[jnp.arange(N1), jnp.arange(N2)],
    )

    params = {
        'conv1': dict(
            W1=xavier_uniform(keys[7], in_channels, spatial_channels),
            W2=xavier_uniform(keys[8], edge_channels, spatial_channels),
            U=xavier_uniform(keys[9], spatial_channels, spatial_channels),
            V=xavier_uniform(keys[10], spatial_channels, spatial_channels),
        ),
        'conv2': dict(
            W1=xavier_uniform(keys[11], spatial_channels, out_channels),
            W2=xavier_uniform(keys[12], edge_channels, out_channels),
            U=xavier_uniform(keys[13], out_channels, out_channels),
            V=xavier_uniform(keys[14], out_channels, out_channels),
        ),
    }

    out = gated_gcn_net(X, g, params)
    out = jax.block_until_ready(out)
    assert out.shape == (B, N2, out_channels)

    # loose-tolerance check vs f32 reference (kernel feeds the MXU bf16 operands)
    ref = _ref_net(X, g, params)
    max_err = float(jnp.max(jnp.abs(out - ref)))
    assert max_err < 0.2, f"kernel deviates from reference: max_err={max_err}"

    print("KERNEL_OK")
</pallas_src>

<mosaic_0001>
module attributes {stable_mosaic.version = 11 : i64} {
  func.func @_fused_gated_gcn_kernel(%arg0: memref<16x8xbf16, #tpu.memory_space<vmem>>, %arg1: memref<8x8xbf16, #tpu.memory_space<vmem>>, %arg2: memref<24x1xbf16, #tpu.memory_space<vmem>>, %arg3: memref<24x16xbf16, #tpu.memory_space<vmem>>, %arg4: memref<8x24xbf16, #tpu.memory_space<vmem>>, %arg5: memref<8x1xf32, #tpu.memory_space<vmem>>, %arg6: memref<4x8xbf16, #tpu.memory_space<vmem>>, %arg7: memref<12x1xbf16, #tpu.memory_space<vmem>>, %arg8: memref<12x8xbf16, #tpu.memory_space<vmem>>, %arg9: memref<4x12xbf16, #tpu.memory_space<vmem>>, %arg10: memref<4x1xf32, #tpu.memory_space<vmem>>, %arg11: memref<8x32xbf16, #tpu.memory_space<vmem>>, %arg12: memref<1x32xbf16, #tpu.memory_space<vmem>>, %arg13: memref<32x32xbf16, #tpu.memory_space<vmem>>, %arg14: memref<32x32xbf16, #tpu.memory_space<vmem>>, %arg15: memref<32x16xbf16, #tpu.memory_space<vmem>>, %arg16: memref<1x16xbf16, #tpu.memory_space<vmem>>, %arg17: memref<16x16xbf16, #tpu.memory_space<vmem>>, %arg18: memref<16x16xbf16, #tpu.memory_space<vmem>>, %arg19: memref<4x16xf32, #tpu.memory_space<vmem>>) attributes {dimension_semantics = [], scalar_prefetch = 0 : i64, scratch_operands = 0 : i64, tpu.core_type = #tpu.core_type<tc>} {
    %c0 = arith.constant 0 : index
    %c0_0 = arith.constant 0 : index
    %0 = vector.load %arg0[%c0, %c0_0] : memref<16x8xbf16, #tpu.memory_space<vmem>>, vector<16x8xbf16>
    %c0_1 = arith.constant 0 : index
    %c0_2 = arith.constant 0 : index
    %1 = vector.load %arg1[%c0_1, %c0_2] : memref<8x8xbf16, #tpu.memory_space<vmem>>, vector<8x8xbf16>
    %c0_3 = arith.constant 0 : index
    %c0_4 = arith.constant 0 : index
    %2 = vector.load %arg11[%c0_3, %c0_4] : memref<8x32xbf16, #tpu.memory_space<vmem>>, vector<8x32xbf16>
    %cst = arith.constant dense<0.000000e+00> : vector<16x32xf32>
    %3 = tpu.matmul %0, %2, %cst {dimension_numbers = #tpu.dot_dimension_numbers<[1], [0], [0], [1], [0, 0, 1, 1], [], []>} : vector<16x8xbf16>, vector<8x32xbf16>, vector<16x32xf32> -> vector<16x32xf32>
    %c0_5 = arith.constant 0 : index
    %c0_6 = arith.constant 0 : index
    %4 = vector.load %arg11[%c0_5, %c0_6] : memref<8x32xbf16, #tpu.memory_space<vmem>>, vector<8x32xbf16>
    %cst_7 = arith.constant dense<0.000000e+00> : vector<8x32xf32>
    %5 = tpu.matmul %1, %4, %cst_7 {dimension_numbers = #tpu.dot_dimension_numbers<[1], [0], [0], [1], [0, 0, 1, 1], [], []>} : vector<8x8xbf16>, vector<8x32xbf16>, vector<8x32xf32> -> vector<8x32xf32>
    %c0_8 = arith.constant 0 : index
    %c0_9 = arith.constant 0 : index
    %6 = vector.load %arg2[%c0_8, %c0_9] : memref<24x1xbf16, #tpu.memory_space<vmem>>, vector<24x1xbf16>
    %c0_10 = arith.constant 0 : index
    %c0_11 = arith.constant 0 : index
    %7 = vector.load %arg12[%c0_10, %c0_11] : memref<1x32xbf16, #tpu.memory_space<vmem>>, vector<1x32xbf16>
    %cst_12 = arith.constant dense<0.000000e+00> : vector<24x32xf32>
    %8 = tpu.matmul %6, %7, %cst_12 {dimension_numbers = #tpu.dot_dimension_numbers<[1], [0], [0], [1], [0, 0, 1, 1], [], []>} : vector<24x1xbf16>, vector<1x32xbf16>, vector<24x32xf32> -> vector<24x32xf32>
    %c0_13 = arith.constant 0 : index
    %c0_14 = arith.constant 0 : index
    %9 = vector.load %arg3[%c0_13, %c0_14] : memref<24x16xbf16, #tpu.memory_space<vmem>>, vector<24x16xbf16>
    %10 = arith.truncf %3 : vector<16x32xf32> to vector<16x32xbf16>
    %cst_15 = arith.constant dense<0.000000e+00> : vector<24x32xf32>
    %11 = tpu.matmul %9, %10, %cst_15 {dimension_numbers = #tpu.dot_dimension_numbers<[1], [0], [0], [1], [0, 0, 1, 1], [], []>} : vector<24x16xbf16>, vector<16x32xbf16>, vector<24x32xf32> -> vector<24x32xf32>
    %12 = arith.truncf %11 : vector<24x32xf32> to vector<24x32xbf16>
    %c0_16 = arith.constant 0 : index
    %c0_17 = arith.constant 0 : index
    %13 = vector.load %arg14[%c0_16, %c0_17] : memref<32x32xbf16, #tpu.memory_space<vmem>>, vector<32x32xbf16>
    %cst_18 = arith.constant dense<0.000000e+00> : vector<24x32xf32>
    %14 = tpu.matmul %12, %13, %cst_18 {dimension_numbers = #tpu.dot_dimension_numbers<[1], [0], [0], [1], [0, 0, 1, 1], [], []>} : vector<24x32xbf16>, vector<32x32xbf16>, vector<24x32xf32> -> vector<24x32xf32>
    %15 = arith.mulf %8, %14 : vector<24x32xf32>
    %c0_19 = arith.constant 0 : index
    %c0_20 = arith.constant 0 : index
    %16 = vector.load %arg4[%c0_19, %c0_20] : memref<8x24xbf16, #tpu.memory_space<vmem>>, vector<8x24xbf16>
    %17 = arith.truncf %15 : vector<24x32xf32> to vector<24x32xbf16>
    %cst_21 = arith.constant dense<0.000000e+00> : vector<8x32xf32>
    %18 = tpu.matmul %16, %17, %cst_21 {dimension_numbers = #tpu.dot_dimension_numbers<[1], [0], [0], [1], [0, 0, 1, 1], [], []>} : vector<8x24xbf16>, vector<24x32xbf16>, vector<8x32xf32> -> vector<8x32xf32>
    %c0_22 = arith.constant 0 : index
    %c0_23 = arith.constant 0 : index
    %19 = vector.load %arg5[%c0_22, %c0_23] : memref<8x1xf32, #tpu.memory_space<vmem>>, vector<8x1xf32>
    %20 = vector.broadcast %19 : vector<8x1xf32> to vector<8x32xf32>
    %21 = arith.mulf %18, %20 : vector<8x32xf32>
    %22 = arith.truncf %5 : vector<8x32xf32> to vector<8x32xbf16>
    %c0_24 = arith.constant 0 : index
    %c0_25 = arith.constant 0 : index
    %23 = vector.load %arg13[%c0_24, %c0_25] : memref<32x32xbf16, #tpu.memory_space<vmem>>, vector<32x32xbf16>
    %cst_26 = arith.constant dense<0.000000e+00> : vector<8x32xf32>
    %24 = tpu.matmul %22, %23, %cst_26 {dimension_numbers = #tpu.dot_dimension_numbers<[1], [0], [0], [1], [0, 0, 1, 1], [], []>} : vector<8x32xbf16>, vector<32x32xbf16>, vector<8x32xf32> -> vector<8x32xf32>
    %25 = arith.addf %24, %21 : vector<8x32xf32>
    %cst_27 = arith.constant dense<0.000000e+00> : vector<8xf32>
    %26 = vector.multi_reduction <add>, %25, %cst_27 [1] : vector<8x32xf32> to vector<8xf32>
    %27 = vector.shape_cast %26 : vector<8xf32> to vector<8x1xf32>
    %cst_28 = arith.constant 3.125000e-02 : f32
    %28 = vector.broadcast %cst_28 : f32 to vector<8x1xf32>
    %29 = arith.mulf %27, %28 : vector<8x1xf32>
    %30 = vector.broadcast %29 : vector<8x1xf32> to vector<8x32xf32>
    %31 = arith.subf %25, %30 : vector<8x32xf32>
    %32 = arith.mulf %31, %31 : vector<8x32xf32>
    %cst_29 = arith.constant dense<0.000000e+00> : vector<8xf32>
    %33 = vector.multi_reduction <add>, %32, %cst_29 [1] : vector<8x32xf32> to vector<8xf32>
    %34 = vector.shape_cast %33 : vector<8xf32> to vector<8x1xf32>
    %cst_30 = arith.constant 3.125000e-02 : f32
    %35 = vector.broadcast %cst_30 : f32 to vector<8x1xf32>
    %36 = arith.mulf %34, %35 : vector<8x1xf32>
    %37 = vector.broadcast %29 : vector<8x1xf32> to vector<8x32xf32>
    %38 = arith.subf %25, %37 : vector<8x32xf32>
    %cst_31 = arith.constant 9.99999974E-6 : f32
    %39 = vector.broadcast %cst_31 : f32 to vector<8x1xf32>
    %40 = arith.addf %36, %39 : vector<8x1xf32>
    %41 = math.rsqrt %40 : vector<8x1xf32>
    %42 = vector.broadcast %41 : vector<8x1xf32> to vector<8x32xf32>
    %43 = arith.mulf %38, %42 : vector<8x32xf32>
    %cst_32 = arith.constant 0.000000e+00 : f32
    %44 = vector.broadcast %cst_32 : f32 to vector<8x32xf32>
    %45 = arith.maximumf %43, %44 : vector<8x32xf32>
    %46 = arith.addf %5, %45 : vector<8x32xf32>
    %cst_33 = arith.constant 0.000000e+00 : f32
    %47 = vector.broadcast %cst_33 : f32 to vector<8x32xf32>
    %48 = arith.cmpf oge, %46, %47 : vector<8x32xf32>
    %cst_34 = arith.constant 0.00999999977 : f32
    %49 = vector.broadcast %cst_34 : f32 to vector<8x32xf32>
    %50 = arith.mulf %49, %46 : vector<8x32xf32>
    %51 = arith.select %48, %46, %50 : vector<8x32xi1>, vector<8x32xf32>
    %52 = arith.truncf %51 : vector<8x32xf32> to vector<8x32xbf16>
    %c0_35 = arith.constant 0 : index
    %c0_36 = arith.constant 0 : index
    %53 = vector.load %arg6[%c0_35, %c0_36] : memref<4x8xbf16, #tpu.memory_space<vmem>>, vector<4x8xbf16>
    %cst_37 = arith.constant dense<0.000000e+00> : vector<4x32xf32>
    %54 = tpu.matmul %53, %52, %cst_37 {dimension_numbers = #tpu.dot_dimension_numbers<[1], [0], [0], [1], [0, 0, 1, 1], [], []>} : vector<4x8xbf16>, vector<8x32xbf16>, vector<4x32xf32> -> vector<4x32xf32>
    %55 = arith.truncf %54 : vector<4x32xf32> to vector<4x32xbf16>
    %c0_38 = arith.constant 0 : index
    %c0_39 = arith.constant 0 : index
    %56 = vector.load %arg15[%c0_38, %c0_39] : memref<32x16xbf16, #tpu.memory_space<vmem>>, vector<32x16xbf16>
    %cst_40 = arith.constant dense<0.000000e+00> : vector<8x16xf32>
    %57 = tpu.matmul %52, %56, %cst_40 {dimension_numbers = #tpu.dot_dimension_numbers<[1], [0], [0], [1], [0, 0, 1, 1], [], []>} : vector<8x32xbf16>, vector<32x16xbf16>, vector<8x16xf32> -> vector<8x16xf32>
    %c0_41 = arith.constant 0 : index
    %c0_42 = arith.constant 0 : index
    %58 = vector.load %arg15[%c0_41, %c0_42] : memref<32x16xbf16, #tpu.memory_space<vmem>>, vector<32x16xbf16>
    %cst_43 = arith.constant dense<0.000000e+00> : vector<4x16xf32>
    %59 = tpu.matmul %55, %58, %cst_43 {dimension_numbers = #tpu.dot_dimension_numbers<[1], [0], [0], [1], [0, 0, 1, 1], [], []>} : vector<4x32xbf16>, vector<32x16xbf16>, vector<4x16xf32> -> vector<4x16xf32>
    %c0_44 = arith.constant 0 : index
    %c0_45 = arith.constant 0 : index
    %60 = vector.load %arg7[%c0_44, %c0_45] : memref<12x1xbf16, #tpu.memory_space<vmem>>, vector<12x1xbf16>
    %c0_46 = arith.constant 0 : index
    %c0_47 = arith.constant 0 : index
    %61 = vector.load %arg16[%c0_46, %c0_47] : memref<1x16xbf16, #tpu.memory_space<vmem>>, vector<1x16xbf16>
    %cst_48 = arith.constant dense<0.000000e+00> : vector<12x16xf32>
    %62 = tpu.matmul %60, %61, %cst_48 {dimension_numbers = #tpu.dot_dimension_numbers<[1], [0], [0], [1], [0, 0, 1, 1], [], []>} : vector<12x1xbf16>, vector<1x16xbf16>, vector<12x16xf32> -> vector<12x16xf32>
    %c0_49 = arith.constant 0 : index
    %c0_50 = arith.constant 0 : index
    %63 = vector.load %arg8[%c0_49, %c0_50] : memref<12x8xbf16, #tpu.memory_space<vmem>>, vector<12x8xbf16>
    %64 = arith.truncf %57 : vector<8x16xf32> to vector<8x16xbf16>
    %cst_51 = arith.constant dense<0.000000e+00> : vector<12x16xf32>
    %65 = tpu.matmul %63, %64, %cst_51 {dimension_numbers = #tpu.dot_dimension_numbers<[1], [0], [0], [1], [0, 0, 1, 1], [], []>} : vector<12x8xbf16>, vector<8x16xbf16>, vector<12x16xf32> -> vector<12x16xf32>
    %66 = arith.truncf %65 : vector<12x16xf32> to vector<12x16xbf16>
    %c0_52 = arith.constant 0 : index
    %c0_53 = arith.constant 0 : index
    %67 = vector.load %arg18[%c0_52, %c0_53] : memref<16x16xbf16, #tpu.memory_space<vmem>>, vector<16x16xbf16>
    %cst_54 = arith.constant dense<0.000000e+00> : vector<12x16xf32>
    %68 = tpu.matmul %66, %67, %cst_54 {dimension_numbers = #tpu.dot_dimension_numbers<[1], [0], [0], [1], [0, 0, 1, 1], [], []>} : vector<12x16xbf16>, vector<16x16xbf16>, vector<12x16xf32> -> vector<12x16xf32>
    %69 = arith.mulf %62, %68 : vector<12x16xf32>
    %c0_55 = arith.constant 0 : index
    %c0_56 = arith.constant 0 : index
    %70 = vector.load %arg9[%c0_55, %c0_56] : memref<4x12xbf16, #tpu.memory_space<vmem>>, vector<4x12xbf16>
    %71 = arith.truncf %69 : vector<12x16xf32> to vector<12x16xbf16>
    %cst_57 = arith.constant dense<0.000000e+00> : vector<4x16xf32>
    %72 = tpu.matmul %70, %71, %cst_57 {dimension_numbers = #tpu.dot_dimension_numbers<[1], [0], [0], [1], [0, 0, 1, 1], [], []>} : vector<4x12xbf16>, vector<12x16xbf16>, vector<4x16xf32> -> vector<4x16xf32>
    %c0_58 = arith.constant 0 : index
    %c0_59 = arith.constant 0 : index
    %73 = vector.load %arg10[%c0_58, %c0_59] : memref<4x1xf32, #tpu.memory_space<vmem>>, vector<4x1xf32>
    %74 = vector.broadcast %73 : vector<4x1xf32> to vector<4x16xf32>
    %75 = arith.mulf %72, %74 : vector<4x16xf32>
    %76 = arith.truncf %59 : vector<4x16xf32> to vector<4x16xbf16>
    %c0_60 = arith.constant 0 : index
    %c0_61 = arith.constant 0 : index
    %77 = vector.load %arg17[%c0_60, %c0_61] : memref<16x16xbf16, #tpu.memory_space<vmem>>, vector<16x16xbf16>
    %cst_62 = arith.constant dense<0.000000e+00> : vector<4x16xf32>
    %78 = tpu.matmul %76, %77, %cst_62 {dimension_numbers = #tpu.dot_dimension_numbers<[1], [0], [0], [1], [0, 0, 1, 1], [], []>} : vector<4x16xbf16>, vector<16x16xbf16>, vector<4x16xf32> -> vector<4x16xf32>
    %79 = arith.addf %78, %75 : vector<4x16xf32>
    %cst_63 = arith.constant dense<0.000000e+00> : vector<4xf32>
    %80 = vector.multi_reduction <add>, %79, %cst_63 [1] : vector<4x16xf32> to vector<4xf32>
    %81 = vector.shape_cast %80 : vector<4xf32> to vector<4x1xf32>
    %cst_64 = arith.constant 6.250000e-02 : f32
    %82 = vector.broadcast %cst_64 : f32 to vector<4x1xf32>
    %83 = arith.mulf %81, %82 : vector<4x1xf32>
    %84 = vector.broadcast %83 : vector<4x1xf32> to vector<4x16xf32>
    %85 = arith.subf %79, %84 : vector<4x16xf32>
    %86 = arith.mulf %85, %85 : vector<4x16xf32>
    %cst_65 = arith.constant dense<0.000000e+00> : vector<4xf32>
    %87 = vector.multi_reduction <add>, %86, %cst_65 [1] : vector<4x16xf32> to vector<4xf32>
    %88 = vector.shape_cast %87 : vector<4xf32> to vector<4x1xf32>
    %cst_66 = arith.constant 6.250000e-02 : f32
    %89 = vector.broadcast %cst_66 : f32 to vector<4x1xf32>
    %90 = arith.mulf %88, %89 : vector<4x1xf32>
    %91 = vector.broadcast %83 : vector<4x1xf32> to vector<4x16xf32>
    %92 = arith.subf %79, %91 : vector<4x16xf32>
    %cst_67 = arith.constant 9.99999974E-6 : f32
    %93 = vector.broadcast %cst_67 : f32 to vector<4x1xf32>
    %94 = arith.addf %90, %93 : vector<4x1xf32>
    %95 = math.rsqrt %94 : vector<4x1xf32>
    %96 = vector.broadcast %95 : vector<4x1xf32> to vector<4x16xf32>
    %97 = arith.mulf %92, %96 : vector<4x16xf32>
    %cst_68 = arith.constant 0.000000e+00 : f32
    %98 = vector.broadcast %cst_68 : f32 to vector<4x16xf32>
    %99 = arith.maximumf %97, %98 : vector<4x16xf32>
    %100 = arith.addf %59, %99 : vector<4x16xf32>
    %c0_69 = arith.constant 0 : index
    %c0_70 = arith.constant 0 : index
    %101 = vector.load %arg19[%c0_69, %c0_70] : memref<4x16xf32, #tpu.memory_space<vmem>>, vector<4x16xf32>
    tpu.vector_store %arg19[%c0_69, %c0_70], %100 {strides = array<i32>} : memref<4x16xf32, #tpu.memory_space<vmem>>, vector<4x16xf32>,
    return
  }
}

</mosaic_0001>

<bundles_post_ra>
// kernel: tpu_custom_call.1
= control target key start
LH: loop header
LB: loop body
LE: loop exit
PB: predicated region body
PF: predicated region fallthrough
CT: control target
= control target key end

     0   :  { %s911_s0 = inlined_call_operand.vmem [shape: bf16[16,8], index: 0, kind: input, shape index: {}]   ;;  %s912_s1 = inlined_call_operand.vmem [shape: bf16[8,8], index: 1, kind: input, shape index: {}]   ;;  %s913_s2 = inlined_call_operand.vmem [shape: bf16[24,1], index: 2, kind: input, shape index: {}]   ;;  %s914_s3 = inlined_call_operand.vmem [shape: bf16[24,16], index: 3, kind: input, shape index: {}]   ;;  %s915_s4 = inlined_call_operand.vmem [shape: bf16[8,24], index: 4, kind: input, shape index: {}]   ;;  %s916_s5 = inlined_call_operand.vmem [shape: f32[8,1], index: 5, kind: input, shape index: {}]   ;;  %s917_s6 = inlined_call_operand.vmem [shape: bf16[4,8], index: 6, kind: input, shape index: {}]   ;;  %s918_s7 = inlined_call_operand.vmem [shape: bf16[12,1], index: 7, kind: input, shape index: {}]   ;;  %s919_s8 = inlined_call_operand.vmem [shape: bf16[12,8], index: 8, kind: input, shape index: {}]   ;;  %s920_s9 = inlined_call_operand.vmem [shape: bf16[4,12], index: 9, kind: input, shape index: {}]   ;;  %s921_s10 = inlined_call_operand.vmem [shape: f32[4,1], index: 10, kind: input, shape index: {}]   ;;  %s922_s11 = inlined_call_operand.vmem [shape: bf16[8,32], index: 11, kind: input, shape index: {}]   ;;  %s923_s12 = inlined_call_operand.vmem [shape: bf16[1,32], index: 12, kind: input, shape index: {}]   ;;  %s924_s13 = inlined_call_operand.vmem [shape: bf16[32,32], index: 13, kind: input, shape index: {}]   ;;  %s925_s14 = inlined_call_operand.vmem [shape: bf16[32,32], index: 14, kind: input, shape index: {}]   ;;  %s926_s15 = inlined_call_operand.vmem [shape: bf16[32,16], index: 15, kind: input, shape index: {}]   ;;  %s927_s16 = inlined_call_operand.vmem [shape: bf16[1,16], index: 16, kind: input, shape index: {}]   ;;  %s928_s17 = inlined_call_operand.vmem [shape: bf16[16,16], index: 17, kind: input, shape index: {}]   ;;  %s929_s18 = inlined_call_operand.vmem [shape: bf16[16,16], index: 18, kind: input, shape index: {}]   ;;  %s930_s19 = inlined_call_operand.hbm [shape: f32[4,16], index: 19, kind: output, shape index: {}]  }
   0x1   :  { %933 = sst [smem:[#allocation5_spill]] %s911_s0 }
   0x2   :  { %934 = sst [smem:[#allocation6_spill]] %s912_s1 }
   0x3   :  { %935 = sst [smem:[#allocation7_spill]] %s913_s2 }
   0x4   :  { %936 = sst [smem:[#allocation8_spill]] %s914_s3 }
   0x5   :  { %v67_v0 = vld [vmem:[%s922_s11] sm:$0xf]  ;;  %vm77_vm0 = vcmask 1043456   ;;  %s937_s1 = sld [smem:[#allocation5_spill]] }
   0x6   :  { %v79_v1 = vsel %vm77_vm0, %v67_v0, 0 }
   0xb   :  { %v647_v2 = vld [vmem:[%s937_s1] sm:$0xff] }
   0xc   :  { %24 = vsyncpa [#allocation3], 0  ;;  %88 = vmatpush.bf16.msra.mxu0 %v79_v1  ;;  %vm73_vm1 = vcmask 64512   ;;  %105 = vmatpush.bf16.msra.mxu1 %v79_v1  ;;  %v114_v3 = vld [vmem:[%s923_s12] sm:$0x1]  ;;  %vm130_vm2 = vcmask 1040384  }
   0xd   :  { %v694_v4 = vmov 0   ;;  %s938_s24 = sld [smem:[#allocation7_spill]]  ;;  %vm123_vm3 = vcmask 7168   ;;  %vm166_vm4 = vcmask 130048   ;;  %v651_v15 = vld [vmem:[%s925_s14 + $0x8] sm:$0xff]  ;;  %v650_v16 = vld [vmem:[%s925_s14] sm:$0xff] }
   0xe   :  { %v807_v5 = vsel %vm130_vm2, 65535, %v694_v4  ;;  %662 = vset.pattern.permute.xlu0 %v694_v4  ;;  %663 = vset.pattern.permute.xlu1 %v694_v4  ;;  %s939_s3 = sld [smem:[#allocation8_spill]]  ;;  %vm209_vm5 = vcmask 261120   ;;  %v260_v32 = vld [vmem:[%s916_s5] sm:$0xff]  ;;  %v653_v42 = vld [vmem:[%s924_s13 + $0x8] sm:$0xff]  ;;  %vm240_vm6 = vcmask 195584  }
   0xf   :  { %581 = vmatmul.msk.bf16.vlgmr.msra.gmra.mxu0 %vm73_vm1, %v647_v2  ;;  %v134_v7 = vand.u32 %v807_v5, %v114_v3  ;;  %s940_s2 = sld [smem:[#allocation6_spill]]  ;;  %263 = vperm.xlu0 %662, %v260_v32   ;;  %v398_v45 = vld [vmem:[%s927_s16] sm:$0x1]  ;;  %v655_v63 = vld [vmem:[%s926_s15 + $0x8] sm:$0xff]  ;;  %vm486_vm11 = vcmask 1045504   ;;  %vm482_vm12 = vcmask 97280  }
  0x10   :  { %222 = vmatpush.bf16.msrb.mxu0 %v651_v15  ;;  %v237_v46 = vld [vmem:[%s915_s4] sm:$0xf]  ;;  %v408_v48 = vand.u32 %v398_v45, %v807_v5  ;;  %vm535_vm13 = vcmask 125952   ;;  %s568_s25 = sshll.u32 %s930_s19, 4  ;;  %s569_s25 = int_to_ptr.hbm [resolvable:$true] %s568_s25 }
  0x11   :  { %143 = vmatpush.bf16.msra.mxu2 %v134_v7  ;;  %v652_v47 = vld [vmem:[%s924_s13] sm:$0xff] }
  0x12   :  { %v654_v0 = vld [vmem:[%s926_s15] sm:$0xff] }
  0x13   :  { %v648_v8 = vld [vmem:[%s938_s24] sm:$0xff]  ;;  %v113_v17 = vld [vmem:[%s938_s24 + $0x8] sm:$0xf] }
  0x14   :  { %587 = vmatmul.msk.bf16.vlgmr.msra.gmra.mxu2 %vm123_vm3, %v648_v8  ;;  %v649_v11 = vld [vmem:[%s939_s3] sm:$0xff]  ;;  %v156_v12 = vld [vmem:[%s939_s3 + $0x8] sm:$0xf]  ;;  %223 = vmatpush.bf16.msrb.mxu0 %v650_v16  ;;  %v120_v18 = vunpack.c.l.b16 %v113_v17 }
  0x15   :  { %v163_v13 = vunpack.c.l.b16 %v156_v12  ;;  %v66_v20 = vld [vmem:[%s940_s2] sm:$0xf] }
  0x16   :  { %v122_v19 = vpack.c.b16 %v120_v18, %v120_v18  ;;  %582 = vmatmul.msk.bf16.vlgmr.msra.gmra.mxu1 %vm73_vm1, %v66_v20  ;;  %v328_v18 = vld [vmem:[%s917_s6] sm:$0x3] }
  0x17   :  { %v165_v14 = vpack.c.b16 %v163_v13, %v163_v13  ;;  %v633_v20 = vld [vmem:[%s919_s8] sm:$0xf] }
  0x18   :  { %389 = vmatpush.bf16.msra.mxu0 %v655_v63 }
  0x1c   :  { %390 = vmatpush.bf16.msra.mxu0 %v654_v0 }
  0x24   :  { %588 = vmatmul.msk.bf16.gmra.mxu2 %vm123_vm3, %v122_v19 }
  0x81   :  { %v264_v52 = vpop.permute.xlu0 %263 }
  0x8c   :  { %v90_v6 = vpop.f32.mrf.mxu0 }
  0x93   :  { %v838_v31 = vpop.f32.mrf.mxu1 }
  0x94   :  { %v92_v9 = vpop.f32.mrf.mxu0  ;;  %v267_v49 = vpack.c.bf16 %v838_v31, %v838_v31 }
  0x95   :  { %v157_v10 = vpack.c.bf16 %v92_v9, %v90_v6 }
  0x97   :  { %180 = vmatpush.bf16.msra.mxu3 %v157_v10  ;;  %v145_v27 = vpop.f32.mrf.mxu2 }
  0x9a   :  { %593 = vmatmul.msk.bf16.vlgmr.msra.gmra.mxu3 %vm166_vm4, %v649_v11 }
  0x9b   :  { %v109_v34 = vpop.f32.mrf.mxu1  ;;  %373 = vmatpush.bf16.msrb.mxu3 %v655_v63 }
  0x9f   :  { %v147_v28 = vpop.f32.mrf.mxu2  ;;  %374 = vmatpush.bf16.msrb.mxu3 %v654_v0 }
  0xa7   :  { %v150_v29 = vpop.f32.mrf.mxu2 }
  0xaa   :  { %594 = vmatmul.msk.bf16.gmra.mxu3 %vm166_vm4, %v165_v14 }
  0xaf   :  { %v152_v30 = vpop.f32.mrf.mxu2 }
  0xb0   :  { %v628_v30 = vld [vmem:[%s918_s7] sm:$0xf] }
 0x11d   :  { %v182_v21 = vpop.f32.mrf.mxu3 }
 0x125   :  { %v184_v22 = vpop.f32.mrf.mxu3 }
 0x126   :  { %v191_v23 = vpack.c.bf16 %v184_v22, %v182_v21  ;;  %v657_v21 = vld [vmem:[%s919_s8] sm:$0x30] }
 0x128   :  { %603 = vmatmul.msk.bf16.vlgmr.msrb.gmra.mxu0 %vm209_vm5, %v191_v23 }
 0x12d   :  { %v187_v24 = vpop.f32.mrf.mxu3 }
 0x12e   :  { %v192_v25 = vpack.c.bf16 %v187_v24, %v187_v24  ;;  %v634_v24 = vor.u32 %v657_v21, %v633_v20 }
 0x135   :  { %v189_v26 = vpop.f32.mrf.mxu3 }
 0x138   :  { %604 = vmatmul.msk.bf16.gmra.mxu0 %vm209_vm5, %v192_v25 }
 0x1a5   :  { %v225_v33 = vpop.f32.mrf.mxu0 }
 0x1a6   :  { %v234_v41 = vmul.f32 %v225_v33, %v145_v27  ;;  %v659_v33 = vld [vmem:[%s928_s17] sm:$0xff] }
 0x1ad   :  { %v227_v35 = vpop.f32.mrf.mxu0 }
 0x1ae   :  { %v235_v39 = vmul.f32 %v227_v35, %v147_v28 }
 0x1b0   :  { %v238_v44 = vpack.c.bf16 %v235_v39, %v234_v41 }
 0x1b5   :  { %v230_v36 = vpop.f32.mrf.mxu0 }
 0x1b6   :  { %v236_v37 = vmul.f32 %v230_v36, %v150_v29  ;;  %v658_v29 = vld [vmem:[%s929_s18] sm:$0xff] }
 0x1b7   :  { %471 = vmatpush.bf16.msra.mxu3 %v658_v29 }
 0x1b8   :  { %v239_v38 = vpack.c.bf16 %v236_v37, %v236_v37 }
 0x1ba   :  { %v245_v40 = vsel %vm77_vm0, %v239_v38, 0 }
 0x1bb   :  { %253 = vmatpush.bf16.msrb.mxu1 %v245_v40 }
 0x1bd   :  { %v232_v43 = vpop.f32.mrf.mxu0 }
 0x1bf   :  { %254 = vmatpush.bf16.msrb.mxu1 %v238_v44 }
 0x1c2   :  { %605 = vmatmul.msk.bf16.vlgmr.msrb.gmra.mxu1 %vm240_vm6, %v237_v46 }
 0x1c3   :  { %293 = vmatpush.bf16.msra.mxu1 %v653_v42  ;;  %v503_v42 = vld [vmem:[%s921_s10] sm:$0xf] }
 0x1c7   :  { %294 = vmatpush.bf16.msra.mxu1 %v652_v47 }
 0x1cb   :  { %417 = vmatpush.bf16.msrb.mxu1 %v408_v48 }
 0x1d2   :  { %614 = vmatmul.msk.bf16.vlgmr.msra.gmra.mxu1 %vm209_vm5, %v267_v49 }
 0x1d3   :  { %529 = vmatpush.bf16.msra.mxu1 %v659_v33 }
 0x23f   :  { %v256_v50 = vpop.f32.mrf.mxu1 }
 0x240   :  { %v266_v53 = vmul.f32 %v264_v52, %v256_v50 }
 0x247   :  { %v258_v51 = vpop.f32.mrf.mxu1 }
 0x248   :  { %v480_v51 = vld [vmem:[%s920_s9] sm:$0x3]  ;;  %s695_s9 = smov [#allocation2]  }
 0x249   :  { %s566_s10 = sshll.u32 %s695_s9, 4  ;;  %s567_s10 = int_to_ptr.vmem [resolvable:$true] %s566_s10 }
 0x24f   :  { %v296_v54 = vpop.f32.mrf.mxu1 }
 0x250   :  { %v297_v55 = vadd.f32 %v296_v54, %v266_v53 }
 0x252   :  { %v300_v56 = vsel %vm209_vm5, %v297_v55, 0.0 }
 0x253   :  { %301 = vadd.xlane.f32.xlu0 %v300_v56 }
 0x257   :  { %v298_v57 = vpop.f32.mrf.mxu1 }
 0x2c6   :  { %v302_v58 = vpop.xlane.xlu0 %301 }
 0x2c7   :  { %v303_v59 = vmul.f32 0.03125, %v302_v58 }
 0x2c9   :  { %v304_v60 = vsub.f32 %v297_v55, %v303_v59 }
 0x2cb   :  { %v305_v61 = vmul.f32 %v304_v60, %v304_v60 }
 0x2cd   :  { %v306_v62 = vsel %vm209_vm5, %v305_v61, 0.0 }
 0x2ce   :  { %307 = vadd.xlane.f32.xlu1 %v306_v62 }
 0x2e7   :  { %506 = vperm.xlu1 %663, %v503_v42  }
 0x341   :  { %v308_v1 = vpop.xlane.xlu1 %307 }
 0x342   :  { %v309_v2 = vmul.f32 0.03125, %v308_v1 }
 0x344   :  { %v310_v3 = vadd.f32 1e-05, %v309_v2 }
 0x346   :  { %664 = vrsqrt.f32 %v310_v3  ;;  %vm317_vm8 = vweird.f32 %v310_v3 }
 0x34c   :  { %v665_v4 = vpop.eup %664 }
 0x34d   :  { %v312_v5 = vmul.f32 %v665_v4, %v310_v3  ;;  %vm318_vm7 = vweird.f32 %v665_v4 }
 0x34e   :  { %vm319_vm9 = vmor %vm317_vm8, %vm318_vm7 }
 0x34f   :  { %v313_v6 = vmul.f32 %v665_v4, %v312_v5 }
 0x351   :  { %v314_v7 = vmul.f32 0.5, %v313_v6 }
 0x353   :  { %v315_v8 = vsub.f32 1.5, %v314_v7 }
 0x355   :  { %v316_v9 = vmul.f32 %v665_v4, %v315_v8 }
 0x357   :  { %v320_v10 = vsel %vm319_vm9, %v665_v4, %v316_v9 }
 0x358   :  { %v321_v11 = vmul.f32 %v320_v10, %v304_v60 }
 0x359   :  { %v507_v52 = vpop.permute.xlu1 %506 }
 0x35a   :  { %v322_v12 = vmax.f32 %v321_v11, 0.0 }
 0x35c   :  { %v323_v13 = vadd.f32 %v322_v12, %v838_v31  ;;  %v656_v31 = vld [vmem:[%s918_s7] sm:$0x30] }
 0x35d   :  { %v629_v32 = vor.u32 %v656_v31, %v628_v30 }
 0x35e   :  { %vm324_vm10 = vcmp.ge.f32.partialorder %v323_v13, 0.0  ;;  %v325_v14 = vmul.f32 0.01, %v323_v13 }
 0x35f   :  { %630 = vmatmul.msk.bf16.vlgmr.msrb.gmra.mxu1 %vm123_vm3, %v629_v32 }
 0x360   :  { %v326_v15 = vsel %vm324_vm10, %v323_v13, %v325_v14 }
 0x361   :  { %v327_v16 = vpack.c.bf16 %v326_v15, %v326_v15 }
 0x363   :  { %624 = vmatmul.msk.bf16.vlgmr.msrb.gmra.mxu3 %vm209_vm5, %v327_v16  ;;  %v333_v17 = vsel %vm77_vm0, %v327_v16, 0 }
 0x364   :  { %342 = vmatpush.bf16.msrb.mxu2 %v333_v17 }
 0x367   :  { %615 = vmatmul.msk.bf16.vlgmr.msrb.gmra.mxu2 %vm73_vm1, %v328_v18 }
 0x3dc   :  { %v419_v40 = vpop.f32.mrf.mxu1 }
 0x3e4   :  { %v421_v41 = vpop.f32.mrf.mxu1 }
 0x3e6   :  { %v376_v19 = vpop.f32.mrf.mxu3 }
 0x3e7   :  { %v426_v22 = vpack.c.bf16 %v376_v19, %v376_v19 }
 0x3e9   :  { %v436_v23 = vsel %vm77_vm0, %v426_v22, 0 }
 0x3ea   :  { %445 = vmatpush.bf16.msra.mxu2 %v436_v23  ;;  %v344_v25 = vpop.f32.mrf.mxu2 }
 0x3eb   :  { %v348_v26 = vpack.c.bf16 %v344_v25, %v344_v25 }
 0x3ed   :  { %635 = vmatmul.msk.bf16.vlgmr.msra.gmra.mxu2 %vm73_vm1, %v634_v24  ;;  %625 = vmatmul.msk.bf16.vlgmr.msra.gmra.mxu0 %vm209_vm5, %v348_v26 }
 0x3ee   :  { %v378_v27 = vpop.f32.mrf.mxu3 }
 0x3f2   :  { %v346_v28 = vpop.f32.mrf.mxu2 }
 0x46a   :  { %v392_v34 = vpop.f32.mrf.mxu0 }
 0x46b   :  { %v510_v35 = vpack.c.bf16 %v392_v34, %v392_v34 }
 0x46d   :  { %646 = vmatmul.msk.bf16.vlgmr.msra.gmra.mxu1 %vm166_vm4, %v510_v35 }
 0x470   :  { %v447_v36 = vpop.f32.mrf.mxu2 }
 0x472   :  { %v394_v37 = vpop.f32.mrf.mxu0 }
 0x478   :  { %v449_v38 = vpop.f32.mrf.mxu2 }
 0x479   :  { %v452_v39 = vpack.c.bf16 %v449_v38, %v447_v36 }
 0x47b   :  { %640 = vmatmul.msk.bf16.vlgmr.msra.gmra.mxu3 %vm166_vm4, %v452_v39 }
 0x4ea   :  { %v531_v43 = vpop.f32.mrf.mxu1 }
 0x4f2   :  { %v533_v44 = vpop.f32.mrf.mxu1 }
 0x4fe   :  { %v473_v45 = vpop.f32.mrf.mxu3 }
 0x4ff   :  { %v478_v47 = vmul.f32 %v473_v45, %v419_v40 }
 0x506   :  { %v475_v46 = vpop.f32.mrf.mxu3 }
 0x507   :  { %v479_v48 = vmul.f32 %v475_v46, %v421_v41 }
 0x509   :  { %v481_v49 = vpack.c.bf16 %v479_v48, %v478_v47 }
 0x50b   :  { %v488_v50 = vsel %vm486_vm11, %v481_v49, 0 }
 0x50c   :  { %497 = vmatpush.bf16.msrb.mxu0 %v488_v50 }
 0x50f   :  { %641 = vmatmul.msk.bf16.vlgmr.msrb.gmra.mxu0 %vm482_vm12, %v480_v51 }
 0x58c   :  { %v499_v53 = vpop.f32.mrf.mxu0 }
 0x58d   :  { %v509_v54 = vmul.f32 %v507_v52, %v499_v53 }
 0x58f   :  { %v532_v55 = vadd.f32 %v531_v43, %v509_v54 }
 0x591   :  { %v536_v56 = vsel %vm535_vm13, %v532_v55, 0.0 }
 0x592   :  { %537 = vadd.xlane.f32.xlu2 %v536_v56 }
 0x594   :  { %v501_v57 = vpop.f32.mrf.mxu0 }
 0x605   :  { %v538_v58 = vpop.xlane.xlu2 %537 }
 0x606   :  { %v539_v59 = vmul.f32 0.0625, %v538_v58 }
 0x608   :  { %v540_v60 = vsub.f32 %v532_v55, %v539_v59 }
 0x60a   :  { %v541_v61 = vmul.f32 %v540_v60, %v540_v60 }
 0x60c   :  { %v542_v62 = vsel %vm535_vm13, %v541_v61, 0.0 }
 0x60d   :  { %543 = vadd.xlane.f32.xlu2 %v542_v62 }
 0x680   :  { %v544_v63 = vpop.xlane.xlu2 %543 }
 0x681   :  { %v545_v0 = vmul.f32 0.0625, %v544_v63 }
 0x683   :  { %v546_v1 = vadd.f32 1e-05, %v545_v0 }
 0x685   :  { %666 = vrsqrt.f32 %v546_v1  ;;  %vm553_vm15 = vweird.f32 %v546_v1 }
 0x68b   :  { %v667_v2 = vpop.eup %666 }
 0x68c   :  { %v548_v3 = vmul.f32 %v667_v2, %v546_v1  ;;  %vm554_vm14 = vweird.f32 %v667_v2 }
 0x68d   :  { %vm555_vm0 = vmor %vm553_vm15, %vm554_vm14 }
 0x68e   :  { %v549_v4 = vmul.f32 %v667_v2, %v548_v3 }
 0x690   :  { %v550_v5 = vmul.f32 0.5, %v549_v4 }
 0x692   :  { %v551_v6 = vsub.f32 1.5, %v550_v5 }
 0x694   :  { %v552_v7 = vmul.f32 %v667_v2, %v551_v6 }
 0x696   :  { %v556_v8 = vsel %vm555_vm0, %v667_v2, %v552_v7 }
 0x697   :  { %v557_v9 = vmul.f32 %v556_v8, %v540_v60 }
 0x699   :  { %v558_v10 = vmax.f32 %v557_v9, 0.0 }
 0x69b   :  { %v559_v11 = vadd.f32 %v558_v10, %v392_v34 }
 0x69d   :  { %560 = vst.msk [vmem:[#allocation2] sm:$0xf] %vm535_vm13, %v559_v11 }
 0x69e   :  { %571 = dma.vmem_to_hbm [thread:$0]  %s567_s10, 64, %s569_s25, [#allocation3]  }
 0x69f   :  { %692 = dma.done.wait [#allocation3], 64  }
 0x6a0   :  { %693 = vsyncadd [#allocation3], 4294967232 }
 0x6a1   :  { %576 = vsyncpa [#allocation3], 1 }

</bundles_post_ra>
